<compile_context>
chip_gen: v5e
topology: v5e:2x2
jax: 0.10.0
libtpu: 0.0.40
codegen_flags: <defaults>
</compile_context>

<pallas_src>
import math

import jax
import jax.numpy as jnp
from jax.experimental import pallas as pl
from jax.experimental.pallas import tpu as pltpu

# -------------------- model hyper-parameters (small, synthetic) --------------
D_MODEL = 32
NHEAD = 4
HEAD_DIM = D_MODEL // NHEAD
L_TGT = 8      # target sequence length (queries)
S_MEM = 16     # memory sequence length (keys / values)
BATCH = 2
EPS = 1e-5


# ------------------------------ fused Pallas kernel ---------------------------
def _cross_attn_kernel(xq_ref, xkv_ref, p_ref, o_ref):
    """xq_ref:  (2, N*L, E)  [0]=tgt,    [1]=query_pos   (batch-major rows)
       xkv_ref: (2, N*S, E)  [0]=memory, [1]=pos
       p_ref:   (E+3, 4E)    rows 0:E=[Wq*s|Wk|Wv|Wo], E=[bq*s|bk|bv|bo],
                             E+1=gamma, E+2=beta (first E lanes)
       o_ref:   (N*L, E)     batch-major rows."""
    f32 = jnp.float32
    E, H, hd = D_MODEL, NHEAD, HEAD_DIM
    N, L, S = BATCH, L_TGT, S_MEM

    tgt = xq_ref[0]                       # (N*L, E)
    q_in = tgt + xq_ref[1]                # tgt + query_pos
    mem = xkv_ref[0]                      # (N*S, E)
    k_in = mem + xkv_ref[1]               # memory + pos

    slab = p_ref[...]
    W = slab[0:E, :]                      # (E, 4E)  [Wq*s | Wk | Wv | Wo]
    b_row = slab[E:E + 1, :]              # (1, 4E)  [bq*s | bk | bv | bo]
    gamma = slab[E + 1:E + 2, 0:E]        # (1, E)
    beta = slab[E + 2:E + 3, 0:E]         # (1, E)

    # Full-width projections against the merged weight slab (K=E contraction,
    # 4E output lanes).  Each result carries its own projection in a distinct
    # 32-lane group; the other lane groups are unused.
    q_all = jnp.dot(q_in, W, preferred_element_type=f32) + b_row   # lanes [0,E)   = Q
    k_all = jnp.dot(k_in, W, preferred_element_type=f32) + b_row   # lanes [E,2E)  = K
    v_all = jnp.dot(mem, W, preferred_element_type=f32) + b_row    # lanes [2E,3E) = V

    def heads(x_all, col0, seq):
        # (N*seq, 4E) -> (H*N, seq, hd); combined batch index b = h*N + n.
        parts = [x_all[:, col0 + h * hd: col0 + (h + 1) * hd].reshape(N, seq, hd)
                 for h in range(H)]
        return jnp.concatenate(parts, axis=0)

    qh = heads(q_all, 0, L)               # (H*N, L, hd)
    kh = heads(k_all, E, S)               # (H*N, S, hd)
    vh = heads(v_all, 2 * E, S)           # (H*N, S, hd)

    # Attention batched over (head, batch); scale already folded into Wq/bq.
    s = jnp.einsum('bld,bsd->bls', qh, kh, preferred_element_type=f32)   # (H*N, L, S)
    s = s - jnp.max(s, axis=-1, keepdims=True)
    p = jnp.exp(s)
    p = p / jnp.sum(p, axis=-1, keepdims=True)                           # exact softmax
    ctx = jnp.einsum('bls,bsd->bld', p, vh, preferred_element_type=f32)  # (H*N, L, hd)

    # Merge heads back onto lanes (PyTorch head-major features), batch-major rows.
    ctx_nle = jnp.concatenate([ctx[h * N:(h + 1) * N] for h in range(H)],
                              axis=-1)                                   # (N, L, E)
    ctx2 = ctx_nle.reshape(N * L, E)

    # Output projection as one lane-dense matmul + bias.
    attn = jnp.dot(ctx2, W[:, 3 * E:4 * E],
                   preferred_element_type=f32) + b_row[:, 3 * E:4 * E]   # (N*L, E)

    # Residual + LayerNorm over the feature lanes.
    x = tgt + attn
    mean = jnp.mean(x, axis=-1, keepdims=True)
    var = jnp.mean(jnp.square(x - mean), axis=-1, keepdims=True)
    o_ref[...] = ((x - mean) * jax.lax.rsqrt(var + EPS) * gamma + beta).astype(o_ref.dtype)


@jax.jit
def cross_attention_layer(tgt, memory, query_pos, pos, param_slab):
    """tgt/query_pos: (L, N, E); memory/pos: (S, N, E); returns (L, N, E)."""
    L, N, E = tgt.shape
    S = memory.shape[0]

    # Batch-major, lane-dense 2-D activations; stack tgt/query_pos and memory/pos
    # so the kernel sees only 3 inputs (two activation slabs + one param slab).
    xq = jnp.stack([tgt, query_pos], axis=0).transpose(0, 2, 1, 3).reshape(2, N * L, E)
    xkv = jnp.stack([memory, pos], axis=0).transpose(0, 2, 1, 3).reshape(2, N * S, E)

    vmem = pl.BlockSpec(memory_space=pltpu.MemorySpace.VMEM)
    out2d = pl.pallas_call(
        _cross_attn_kernel,
        out_shape=jax.ShapeDtypeStruct((N * L, E), tgt.dtype),
        in_specs=[vmem, vmem, vmem],
        out_specs=vmem,
    )(xq, xkv, param_slab)

    # Restore the PyTorch (L, N, E) layout.
    return out2d.reshape(N, L, E).transpose(1, 0, 2)


# --------------------------- parameter init / packing -------------------------
def init_params(key):
    """PyTorch-equivalent parameters (xavier_uniform_ on 2-D weights, zero bias)."""
    E = D_MODEL
    k1, k2 = jax.random.split(key)
    lim_in = math.sqrt(6.0 / (E + 3 * E))
    in_proj_w = jax.random.uniform(k1, (3 * E, E), jnp.float32, -lim_in, lim_in)
    lim_out = math.sqrt(6.0 / (E + E))
    out_proj_w = jax.random.uniform(k2, (E, E), jnp.float32, -lim_out, lim_out)
    return {
        "in_proj_weight": in_proj_w,                       # (3E, E)
        "in_proj_bias": jnp.zeros((3 * E,), jnp.float32),  # (3E,)
        "out_proj_weight": out_proj_w,                     # (E, E)
        "out_proj_bias": jnp.zeros((E,), jnp.float32),     # (E,)
        "ln_weight": jnp.ones((E,), jnp.float32),          # (E,)
        "ln_bias": jnp.zeros((E,), jnp.float32),           # (E,)
    }


def pack_params(p):
    """One-time repack of the PyTorch tensors into a single lane-dense slab.

    Returns (E+3, 4E) float32:
      rows 0:E   = [Wq*scale | Wk | Wv | Wo]   (each (E, E), x @ W layout)
      row  E     = [bq*scale | bk | bv | bo]
      row  E+1   = LayerNorm gamma (first E lanes)
      row  E+2   = LayerNorm beta  (first E lanes)
    """
    E = D_MODEL
    scale = 1.0 / math.sqrt(HEAD_DIM)
    w_in, b_in = p["in_proj_weight"], p["in_proj_bias"]
    w_slab = jnp.concatenate(
        [w_in[:E].T * scale, w_in[E:2 * E].T, w_in[2 * E:].T, p["out_proj_weight"].T],
        axis=1)                                                      # (E, 4E)
    bias_row = jnp.concatenate(
        [b_in[:E] * scale, b_in[E:2 * E], b_in[2 * E:], p["out_proj_bias"]])[None, :]
    gamma_row = jnp.pad(p["ln_weight"], (0, 3 * E))[None, :]
    beta_row = jnp.pad(p["ln_bias"], (0, 3 * E))[None, :]
    return jnp.concatenate([w_slab, bias_row, gamma_row, beta_row], axis=0)  # (E+3, 4E)


# ------------------------------ pure-JAX reference ----------------------------
def reference(tgt, memory, query_pos, pos, p):
    E, H, hd = D_MODEL, NHEAD, HEAD_DIM
    w_in, b_in = p["in_proj_weight"], p["in_proj_bias"]
    wq, wk, wv = w_in[:E], w_in[E:2 * E], w_in[2 * E:]
    bq, bk, bv = b_in[:E], b_in[E:2 * E], b_in[2 * E:]
    wo, bo = p["out_proj_weight"], p["out_proj_bias"]

    q = jnp.einsum('lne,fe->lnf', tgt + query_pos, wq) + bq
    k = jnp.einsum('sne,fe->snf', memory + pos, wk) + bk
    v = jnp.einsum('sne,fe->snf', memory, wv) + bv

    L, N, _ = q.shape
    S = k.shape[0]
    qh = q.reshape(L, N, H, hd)
    kh = k.reshape(S, N, H, hd)
    vh = v.reshape(S, N, H, hd)
    scores = jnp.einsum('lnhd,snhd->nhls', qh, kh) / math.sqrt(hd)
    probs = jax.nn.softmax(scores, axis=-1)
    ctx = jnp.einsum('nhls,snhd->lnhd', probs, vh).reshape(L, N, E)
    tgt2 = jnp.einsum('lne,fe->lnf', ctx, wo) + bo

    x = tgt + tgt2
    mean = jnp.mean(x, axis=-1, keepdims=True)
    var = jnp.mean((x - mean) ** 2, axis=-1, keepdims=True)
    return (x - mean) / jnp.sqrt(var + EPS) * p["ln_weight"] + p["ln_bias"]


# ------------------------------------ main -------------------------------------
if __name__ == "__main__":
    key = jax.random.PRNGKey(0)
    kp, k_tgt, k_mem, k_qp, k_pos = jax.random.split(key, 5)

    params = init_params(kp)
    tgt = jax.random.normal(k_tgt, (L_TGT, BATCH, D_MODEL), jnp.float32)
    memory = jax.random.normal(k_mem, (S_MEM, BATCH, D_MODEL), jnp.float32)
    query_pos = jax.random.normal(k_qp, (L_TGT, BATCH, D_MODEL), jnp.float32)
    pos = jax.random.normal(k_pos, (S_MEM, BATCH, D_MODEL), jnp.float32)

    slab = pack_params(params)

    out = cross_attention_layer(tgt, memory, query_pos, pos, slab)
    out = jax.block_until_ready(out)

    ref = reference(tgt, memory, query_pos, pos, params)
    assert out.shape == (L_TGT, BATCH, D_MODEL)
    err = jnp.max(jnp.abs(out - ref))
    assert jnp.allclose(out, ref, atol=1e-4, rtol=1e-4), f"max abs err {err}"

    print("KERNEL_OK")
</pallas_src>

<mosaic_0001>
module attributes {stable_mosaic.version = 11 : i64} {
  func.func @_cross_attn_kernel(%arg0: memref<2x16x32xf32, #tpu.memory_space<vmem>>, %arg1: memref<2x32x32xf32, #tpu.memory_space<vmem>>, %arg2: memref<35x128xf32, #tpu.memory_space<vmem>>, %arg3: memref<16x32xf32, #tpu.memory_space<vmem>>) attributes {dimension_semantics = [], scalar_prefetch = 0 : i64, scratch_operands = 0 : i64, tpu.core_type = #tpu.core_type<tc>} {
    %c0 = arith.constant 0 : index
    %c0_0 = arith.constant 0 : index
    %c0_1 = arith.constant 0 : index
    %0 = vector.load %arg0[%c0, %c0_0, %c0_1] : memref<2x16x32xf32, #tpu.memory_space<vmem>>, vector<1x16x32xf32>
    %1 = vector.shape_cast %0 : vector<1x16x32xf32> to vector<16x32xf32>
    %c1 = arith.constant 1 : index
    %c0_2 = arith.constant 0 : index
    %c0_3 = arith.constant 0 : index
    %2 = vector.load %arg0[%c1, %c0_2, %c0_3] : memref<2x16x32xf32, #tpu.memory_space<vmem>>, vector<1x16x32xf32>
    %3 = vector.shape_cast %2 : vector<1x16x32xf32> to vector<16x32xf32>
    %4 = arith.addf %1, %3 : vector<16x32xf32>
    %c0_4 = arith.constant 0 : index
    %c0_5 = arith.constant 0 : index
    %c0_6 = arith.constant 0 : index
    %5 = vector.load %arg1[%c0_4, %c0_5, %c0_6] : memref<2x32x32xf32, #tpu.memory_space<vmem>>, vector<1x32x32xf32>
    %6 = vector.shape_cast %5 : vector<1x32x32xf32> to vector<32x32xf32>
    %c1_7 = arith.constant 1 : index
    %c0_8 = arith.constant 0 : index
    %c0_9 = arith.constant 0 : index
    %7 = vector.load %arg1[%c1_7, %c0_8, %c0_9] : memref<2x32x32xf32, #tpu.memory_space<vmem>>, vector<1x32x32xf32>
    %8 = vector.shape_cast %7 : vector<1x32x32xf32> to vector<32x32xf32>
    %9 = arith.addf %6, %8 : vector<32x32xf32>
    %c0_10 = arith.constant 0 : index
    %c0_11 = arith.constant 0 : index
    %10 = vector.load %arg2[%c0_10, %c0_11] : memref<35x128xf32, #tpu.memory_space<vmem>>, vector<35x128xf32>
    %11 = vector.extract_strided_slice %10 {offsets = [0, 0], sizes = [32, 128], strides = [1, 1]} : vector<35x128xf32> to vector<32x128xf32>
    %12 = vector.extract_strided_slice %10 {offsets = [32, 0], sizes = [1, 128], strides = [1, 1]} : vector<35x128xf32> to vector<1x128xf32>
    %13 = vector.extract_strided_slice %10 {offsets = [33, 0], sizes = [1, 32], strides = [1, 1]} : vector<35x128xf32> to vector<1x32xf32>
    %14 = vector.extract_strided_slice %10 {offsets = [34, 0], sizes = [1, 32], strides = [1, 1]} : vector<35x128xf32> to vector<1x32xf32>
    %cst = arith.constant dense<0.000000e+00> : vector<16x128xf32>
    %15 = tpu.matmul %4, %11, %cst {dimension_numbers = #tpu.dot_dimension_numbers<[1], [0], [0], [1], [0, 0, 1, 1], [], []>} : vector<16x32xf32>, vector<32x128xf32>, vector<16x128xf32> -> vector<16x128xf32>
    %16 = vector.broadcast %12 : vector<1x128xf32> to vector<16x128xf32>
    %17 = arith.addf %15, %16 : vector<16x128xf32>
    %cst_12 = arith.constant dense<0.000000e+00> : vector<32x128xf32>
    %18 = tpu.matmul %9, %11, %cst_12 {dimension_numbers = #tpu.dot_dimension_numbers<[1], [0], [0], [1], [0, 0, 1, 1], [], []>} : vector<32x32xf32>, vector<32x128xf32>, vector<32x128xf32> -> vector<32x128xf32>
    %19 = vector.broadcast %12 : vector<1x128xf32> to vector<32x128xf32>
    %20 = arith.addf %18, %19 : vector<32x128xf32>
    %cst_13 = arith.constant dense<0.000000e+00> : vector<32x128xf32>
    %21 = tpu.matmul %6, %11, %cst_13 {dimension_numbers = #tpu.dot_dimension_numbers<[1], [0], [0], [1], [0, 0, 1, 1], [], []>} : vector<32x32xf32>, vector<32x128xf32>, vector<32x128xf32> -> vector<32x128xf32>
    %22 = vector.broadcast %12 : vector<1x128xf32> to vector<32x128xf32>
    %23 = arith.addf %21, %22 : vector<32x128xf32>
    %24 = vector.extract_strided_slice %17 {offsets = [0, 0], sizes = [16, 8], strides = [1, 1]} : vector<16x128xf32> to vector<16x8xf32>
    %25 = vector.shape_cast %24 : vector<16x8xf32> to vector<2x8x8xf32>
    %26 = vector.extract_strided_slice %17 {offsets = [0, 8], sizes = [16, 8], strides = [1, 1]} : vector<16x128xf32> to vector<16x8xf32>
    %27 = vector.shape_cast %26 : vector<16x8xf32> to vector<2x8x8xf32>
    %28 = vector.extract_strided_slice %17 {offsets = [0, 16], sizes = [16, 8], strides = [1, 1]} : vector<16x128xf32> to vector<16x8xf32>
    %29 = vector.shape_cast %28 : vector<16x8xf32> to vector<2x8x8xf32>
    %30 = vector.extract_strided_slice %17 {offsets = [0, 24], sizes = [16, 8], strides = [1, 1]} : vector<16x128xf32> to vector<16x8xf32>
    %31 = vector.shape_cast %30 : vector<16x8xf32> to vector<2x8x8xf32>
    %32 = tpu.concatenate %25, %27, %29, %31 in 0 : vector<2x8x8xf32>, vector<2x8x8xf32>, vector<2x8x8xf32>, vector<2x8x8xf32> -> vector<8x8x8xf32>
    %33 = vector.extract_strided_slice %20 {offsets = [0, 32], sizes = [32, 8], strides = [1, 1]} : vector<32x128xf32> to vector<32x8xf32>
    %34 = vector.shape_cast %33 : vector<32x8xf32> to vector<2x16x8xf32>
    %35 = vector.extract_strided_slice %20 {offsets = [0, 40], sizes = [32, 8], strides = [1, 1]} : vector<32x128xf32> to vector<32x8xf32>
    %36 = vector.shape_cast %35 : vector<32x8xf32> to vector<2x16x8xf32>
    %37 = vector.extract_strided_slice %20 {offsets = [0, 48], sizes = [32, 8], strides = [1, 1]} : vector<32x128xf32> to vector<32x8xf32>
    %38 = vector.shape_cast %37 : vector<32x8xf32> to vector<2x16x8xf32>
    %39 = vector.extract_strided_slice %20 {offsets = [0, 56], sizes = [32, 8], strides = [1, 1]} : vector<32x128xf32> to vector<32x8xf32>
    %40 = vector.shape_cast %39 : vector<32x8xf32> to vector<2x16x8xf32>
    %41 = tpu.concatenate %34, %36, %38, %40 in 0 : vector<2x16x8xf32>, vector<2x16x8xf32>, vector<2x16x8xf32>, vector<2x16x8xf32> -> vector<8x16x8xf32>
    %42 = vector.extract_strided_slice %23 {offsets = [0, 64], sizes = [32, 8], strides = [1, 1]} : vector<32x128xf32> to vector<32x8xf32>
    %43 = vector.shape_cast %42 : vector<32x8xf32> to vector<2x16x8xf32>
    %44 = vector.extract_strided_slice %23 {offsets = [0, 72], sizes = [32, 8], strides = [1, 1]} : vector<32x128xf32> to vector<32x8xf32>
    %45 = vector.shape_cast %44 : vector<32x8xf32> to vector<2x16x8xf32>
    %46 = vector.extract_strided_slice %23 {offsets = [0, 80], sizes = [32, 8], strides = [1, 1]} : vector<32x128xf32> to vector<32x8xf32>
    %47 = vector.shape_cast %46 : vector<32x8xf32> to vector<2x16x8xf32>
    %48 = vector.extract_strided_slice %23 {offsets = [0, 88], sizes = [32, 8], strides = [1, 1]} : vector<32x128xf32> to vector<32x8xf32>
    %49 = vector.shape_cast %48 : vector<32x8xf32> to vector<2x16x8xf32>
    %50 = tpu.concatenate %43, %45, %47, %49 in 0 : vector<2x16x8xf32>, vector<2x16x8xf32>, vector<2x16x8xf32>, vector<2x16x8xf32> -> vector<8x16x8xf32>
    "tpu.trace_start"() <{level = 10 : i32, message = "bld,bsd->bls"}> : () -> ()
    %cst_14 = arith.constant dense<0.000000e+00> : vector<8x8x16xf32>
    %51 = tpu.matmul %32, %41, %cst_14 {dimension_numbers = #tpu.dot_dimension_numbers<[2], [2], [1], [1], [0, 0, 0, 1, 1, 1], [0], [0]>} : vector<8x8x8xf32>, vector<8x16x8xf32>, vector<8x8x16xf32> -> vector<8x8x16xf32>
    "tpu.trace_stop"() : () -> ()
    %cst_15 = arith.constant dense<0xFF800000> : vector<8x8xf32>
    %52 = vector.multi_reduction <maximumf>, %51, %cst_15 [2] : vector<8x8x16xf32> to vector<8x8xf32>
    %53 = vector.shape_cast %52 : vector<8x8xf32> to vector<8x8x1xf32>
    %54 = vector.broadcast %53 : vector<8x8x1xf32> to vector<8x8x16xf32>
    %55 = arith.subf %51, %54 : vector<8x8x16xf32>
    %56 = math.exp %55 : vector<8x8x16xf32>
    %cst_16 = arith.constant dense<0.000000e+00> : vector<8x8xf32>
    %57 = vector.multi_reduction <add>, %56, %cst_16 [2] : vector<8x8x16xf32> to vector<8x8xf32>
    %58 = vector.shape_cast %57 : vector<8x8xf32> to vector<8x8x1xf32>
    %59 = vector.broadcast %58 : vector<8x8x1xf32> to vector<8x8x16xf32>
    %60 = arith.divf %56, %59 : vector<8x8x16xf32>
    "tpu.trace_start"() <{level = 10 : i32, message = "bls,bsd->bld"}> : () -> ()
    %cst_17 = arith.constant dense<0.000000e+00> : vector<8x8x8xf32>
    %61 = tpu.matmul %60, %50, %cst_17 {dimension_numbers = #tpu.dot_dimension_numbers<[2], [1], [1], [2], [0, 0, 0, 1, 1, 2], [0], [0]>} : vector<8x8x16xf32>, vector<8x16x8xf32>, vector<8x8x8xf32> -> vector<8x8x8xf32>
    "tpu.trace_stop"() : () -> ()
    %62 = vector.extract_strided_slice %61 {offsets = [0, 0, 0], sizes = [2, 8, 8], strides = [1, 1, 1]} : vector<8x8x8xf32> to vector<2x8x8xf32>
    %63 = vector.extract_strided_slice %61 {offsets = [2, 0, 0], sizes = [2, 8, 8], strides = [1, 1, 1]} : vector<8x8x8xf32> to vector<2x8x8xf32>
    %64 = vector.extract_strided_slice %61 {offsets = [4, 0, 0], sizes = [2, 8, 8], strides = [1, 1, 1]} : vector<8x8x8xf32> to vector<2x8x8xf32>
    %65 = vector.extract_strided_slice %61 {offsets = [6, 0, 0], sizes = [2, 8, 8], strides = [1, 1, 1]} : vector<8x8x8xf32> to vector<2x8x8xf32>
    %66 = tpu.concatenate %62, %63, %64, %65 in 2 : vector<2x8x8xf32>, vector<2x8x8xf32>, vector<2x8x8xf32>, vector<2x8x8xf32> -> vector<2x8x32xf32>
    %67 = vector.shape_cast %66 : vector<2x8x32xf32> to vector<16x32xf32>
    %68 = vector.extract_strided_slice %11 {offsets = [0, 96], sizes = [32, 32], strides = [1, 1]} : vector<32x128xf32> to vector<32x32xf32>
    %cst_18 = arith.constant dense<0.000000e+00> : vector<16x32xf32>
    %69 = tpu.matmul %67, %68, %cst_18 {dimension_numbers = #tpu.dot_dimension_numbers<[1], [0], [0], [1], [0, 0, 1, 1], [], []>} : vector<16x32xf32>, vector<32x32xf32>, vector<16x32xf32> -> vector<16x32xf32>
    %70 = vector.extract_strided_slice %12 {offsets = [0, 96], sizes = [1, 32], strides = [1, 1]} : vector<1x128xf32> to vector<1x32xf32>
    %71 = vector.broadcast %70 : vector<1x32xf32> to vector<16x32xf32>
    %72 = arith.addf %69, %71 : vector<16x32xf32>
    %73 = arith.addf %1, %72 : vector<16x32xf32>
    %cst_19 = arith.constant dense<0.000000e+00> : vector<16xf32>
    %74 = vector.multi_reduction <add>, %73, %cst_19 [1] : vector<16x32xf32> to vector<16xf32>
    %75 = vector.shape_cast %74 : vector<16xf32> to vector<16x1xf32>
    %cst_20 = arith.constant 3.200000e+01 : f32
    %76 = vector.broadcast %cst_20 : f32 to vector<16x1xf32>
    %77 = arith.divf %75, %76 : vector<16x1xf32>
    %78 = vector.broadcast %77 : vector<16x1xf32> to vector<16x32xf32>
    %79 = arith.subf %73, %78 : vector<16x32xf32>
    %80 = arith.mulf %79, %79 : vector<16x32xf32>
    %cst_21 = arith.constant dense<0.000000e+00> : vector<16xf32>
    %81 = vector.multi_reduction <add>, %80, %cst_21 [1] : vector<16x32xf32> to vector<16xf32>
    %82 = vector.shape_cast %81 : vector<16xf32> to vector<16x1xf32>
    %cst_22 = arith.constant 3.200000e+01 : f32
    %83 = vector.broadcast %cst_22 : f32 to vector<16x1xf32>
    %84 = arith.divf %82, %83 : vector<16x1xf32>
    %85 = vector.broadcast %77 : vector<16x1xf32> to vector<16x32xf32>
    %86 = arith.subf %73, %85 : vector<16x32xf32>
    %cst_23 = arith.constant 9.99999974E-6 : f32
    %87 = vector.broadcast %cst_23 : f32 to vector<16x1xf32>
    %88 = arith.addf %84, %87 : vector<16x1xf32>
    %89 = math.rsqrt %88 : vector<16x1xf32>
    %90 = vector.broadcast %89 : vector<16x1xf32> to vector<16x32xf32>
    %91 = arith.mulf %86, %90 : vector<16x32xf32>
    %92 = vector.broadcast %13 : vector<1x32xf32> to vector<16x32xf32>
    %93 = arith.mulf %91, %92 : vector<16x32xf32>
    %94 = vector.broadcast %14 : vector<1x32xf32> to vector<16x32xf32>
    %95 = arith.addf %93, %94 : vector<16x32xf32>
    %c0_24 = arith.constant 0 : index
    %c0_25 = arith.constant 0 : index
    %96 = vector.load %arg3[%c0_24, %c0_25] : memref<16x32xf32, #tpu.memory_space<vmem>>, vector<16x32xf32>
    tpu.vector_store %arg3[%c0_24, %c0_25], %95 {strides = array<i32>} : memref<16x32xf32, #tpu.memory_space<vmem>>, vector<16x32xf32>,
    return
  }
}

</mosaic_0001>

<bundles_post_ra>
// kernel: cross_attention_layer.1
= control target key start
LH: loop header
LB: loop body
LE: loop exit
PB: predicated region body
PF: predicated region fallthrough
CT: control target
= control target key end

     0   :  { %vm40_vm0 = vcmask 261120   ;;  %s1217_s19 = smov 112   ;;  %s1218_s20 = smov 120   ;;  %vm226_vm1 = vcmask 64512   ;;  %vm463_vm2 = vcmask 130048   ;;  %s1530_s2 = inlined_call_operand.vmem [shape: f32[35,128], index: 2, kind: input, shape index: {}]   ;;  %s1531_s1 = inlined_call_operand.vmem [shape: f32[2,32,32], index: 1, kind: input, shape index: {}]   ;;  %s1532_s0 = inlined_call_operand.vmem [shape: f32[2,16,32], index: 0, kind: input, shape index: {}]   ;;  %s1533_s3 = inlined_call_operand.vmem [shape: f32[16,32], index: 3, kind: output, shape index: {}]  }
   0x1   :  { %v1250_v0 = vld [vmem:[%s1530_s2 + $0x18] sm:$0xff]  ;;  %v1255_v1 = vld [vmem:[%s1530_s2 + $0x10] sm:$0xff]  ;;  %v21_v2 = vld [vmem:[%s1531_s1] sm:$0xff]  ;;  %s1220_s21 = smov 96   ;;  %s1221_s22 = smov 64  }
   0x2   :  { %94 = vmatpush.msra.mxu1 %v1250_v0  ;;  %59 = vmatpush.msra.mxu0 %v1250_v0  ;;  %v1265_v3 = vld [vmem:[%s1530_s2 + $0x8] sm:$0xff]  ;;  %v1035_v4 = vld [vmem:[%s1531_s1 + $0x20] sm:$0xff]  ;;  %v1033_v8 = vld [vmem:[%s1532_s0 + $0x10] sm:$0xff]  ;;  %s1222_s23 = smov 32   ;;  %s1223_s24 = smov 8  }
   0x3   :  { %135 = vmatpush.msra.mxu2 %v1250_v0  ;;  %1083 = vmatpush.msra.mxu3 %v1250_v0  ;;  %v1277_v5 = vld [vmem:[%s1530_s2] sm:$0xff]  ;;  %v30_v6 = vadd.f32 %v1035_v4, %v21_v2  ;;  %v22_v10 = vld [vmem:[%s1531_s1 + $0x8] sm:$0xff]  ;;  %v24_v12 = vld [vmem:[%s1531_s1 + $0x18] sm:$0xff]  ;;  %s1224_s25 = smov 16   ;;  %s1225_s26 = smov 24  }
   0x4   :  { %95 = vmatpush.msra.mxu1 %v1255_v1  ;;  %60 = vmatpush.msra.mxu0 %v1255_v1  ;;  %v14_v7 = vld [vmem:[%s1532_s0] sm:$0xff]  ;;  %v1036_v11 = vld [vmem:[%s1531_s1 + $0x28] sm:$0xff]  ;;  %v1034_v14 = vld [vmem:[%s1532_s0 + $0x18] sm:$0xff] }
   0x5   :  { %136 = vmatpush.msra.mxu2 %v1255_v1  ;;  %1084 = vmatpush.msra.mxu3 %v1255_v1  ;;  %v19_v9 = vadd.f32 %v1033_v8, %v14_v7  ;;  %v1307_v13 = vld [vmem:[%s1532_s0 + $0x8] sm:$0xff]  ;;  %v31_v15 = vadd.f32 %v1036_v11, %v22_v10  ;;  %v23_v17 = vld [vmem:[%s1531_s1 + $0x10] sm:$0xff]  ;;  %v1038_v20 = vld [vmem:[%s1531_s1 + $0x38] sm:$0xff] }
   0x6   :  { %96 = vmatpush.msra.mxu1 %v1265_v3  ;;  %61 = vmatpush.msra.mxu0 %v1265_v3  ;;  %v20_v16 = vadd.f32 %v1034_v14, %v1307_v13  ;;  %v1037_v18 = vld [vmem:[%s1531_s1 + $0x30] sm:$0xff]  ;;  %v33_v21 = vadd.f32 %v1038_v20, %v24_v12  ;;  %v38_v22 = vld [vmem:[%s1530_s2 + $0x20] sm:$0x7]  ;;  %s1219_s1 = smov 104  }
   0x7   :  { %137 = vmatpush.msra.mxu2 %v1265_v3  ;;  %1085 = vmatpush.msra.mxu3 %v1265_v3  ;;  %v32_v19 = vadd.f32 %v1037_v18, %v23_v17  ;;  %v1335_v23 = vperm.slane %v38_v22, 0 }
   0x8   :  { %97 = vmatpush.msra.mxu1 %v1277_v5  ;;  %62 = vmatpush.msra.mxu0 %v1277_v5 }
   0x9   :  { %1041 = vmatmul.msk.f32.vlgmr.msra.gmra.mxu1 %vm40_vm0, %v30_v6  ;;  %1039 = vmatmul.msk.f32.vlgmr.msra.gmra.mxu0 %vm40_vm0, %v19_v9 }
   0xa   :  { %138 = vmatpush.msra.mxu2 %v1277_v5  ;;  %1086 = vmatpush.msra.mxu3 %v1277_v5 }
   0xb   :  { %1045 = vmatmul.msk.f32.vlgmr.msra.gmra.mxu2 %vm40_vm0, %v21_v2  ;;  %1048 = vmatmul.msk.f32.vlgmr.msra.gmra.mxu3 %vm40_vm0, %v24_v12 }
  0x11   :  { %1042 = vmatmul.msk.f32.gmra.mxu1 %vm40_vm0, %v31_v15  ;;  %1040 = vmatmul.msk.f32.gmra.mxu0 %vm40_vm0, %v20_v16 }
  0x13   :  { %1046 = vmatmul.msk.f32.gmra.mxu2 %vm40_vm0, %v22_v10 }
  0x19   :  { %1043 = vmatmul.msk.f32.gmra.mxu1 %vm40_vm0, %v32_v19 }
  0x1b   :  { %1047 = vmatmul.msk.f32.gmra.mxu2 %vm40_vm0, %v23_v17 }
  0x21   :  { %1044 = vmatmul.msk.f32.gmra.mxu1 %vm40_vm0, %v33_v21 }
  0x86   :  { %v99_v24 = vpop.f32.mrf.mxu1  ;;  %v64_v32 = vpop.f32.mrf.mxu0 }
  0x87   :  { %v100_v25 = vadd.f32 %v99_v24, %v1335_v23  ;;  %v65_v33 = vadd.f32 %v64_v32, %v1335_v23 }
  0x89   :  { %178 = vrot.lane.b32.xlu0 %v100_v25, %s1217_s19  ;;  %170 = vrot.lane.b32.xlu1 %v100_v25, %s1218_s20 }
  0x8e   :  { %v102_v26 = vpop.f32.mrf.mxu1  ;;  %v67_v34 = vpop.f32.mrf.mxu0 }
  0x8f   :  { %v103_v27 = vadd.f32 %v102_v26, %v1335_v23  ;;  %v68_v35 = vadd.f32 %v67_v34, %v1335_v23  ;;  %v140_v46 = vpop.f32.mrf.mxu2  ;;  %v149_v59 = vpop.f32.mrf.mxu3 }
  0x90   :  { %v141_v53 = vadd.f32 %v140_v46, %v1335_v23  ;;  %v150_v61 = vadd.f32 %v149_v59, %v1335_v23 }
  0x91   :  { %180 = vrot.lane.b32.xlu2 %v103_v27, %s1217_s19  ;;  %172 = vrot.lane.b32.xlu0 %v103_v27, %s1218_s20 }
  0x96   :  { %v105_v28 = vpop.f32.mrf.mxu1 }
  0x97   :  { %v106_v29 = vadd.f32 %v105_v28, %v1335_v23  ;;  %v143_v50 = vpop.f32.mrf.mxu2 }
  0x98   :  { %v144_v54 = vadd.f32 %v143_v50, %v1335_v23 }
  0x99   :  { %188 = vrot.lane.b32.xlu2 %v103_v27, %s1219_s1  ;;  %174 = vrot.lane.b32.xlu1 %v106_v29, %s1218_s20 }
  0x9a   :  { %v1102_v55 = vpack.i.bf16 %v141_v53, %v144_v54 }
  0x9e   :  { %v108_v30 = vpop.f32.mrf.mxu1 }
  0x9f   :  { %v109_v31 = vadd.f32 %v108_v30, %v1335_v23  ;;  %v146_v58 = vpop.f32.mrf.mxu2 }
  0xa0   :  { %v1388_v60 = vadd.f32 %v146_v58, %v1335_v23 }
  0xa1   :  { %224 = vrot.lane.b32.xlu2 %v103_v27, %s1220_s21  ;;  %176 = vrot.lane.b32.xlu0 %v109_v31, %s1218_s20 }
  0xa2   :  { %182 = vrot.lane.b32.xlu1 %v106_v29, %s1217_s19  ;;  %v1117_v62 = vpack.i.bf16 %v1388_v60, %v150_v61 }
  0xa9   :  { %186 = vrot.lane.b32.xlu0 %v100_v25, %s1219_s1  ;;  %184 = vrot.lane.b32.xlu2 %v109_v31, %s1217_s19 }
  0xaa   :  { %222 = vrot.lane.b32.xlu1 %v100_v25, %s1220_s21 }
  0xb1   :  { %190 = vrot.lane.b32.xlu0 %v106_v29, %s1219_s1  ;;  %255 = vrot.lane.b32.xlu2 %v109_v31, %s1220_s21 }
  0xb2   :  { %154 = vrot.lane.b32.xlu1 %v65_v33, %s1218_s20 }
  0xb9   :  { %253 = vrot.lane.b32.xlu0 %v106_v29, %s1220_s21 }
  0xba   :  { %192 = vrot.lane.b32.xlu1 %v109_v31, %s1219_s1 }
  0xc2   :  { %156 = vrot.lane.b32.xlu1 %v68_v35, %s1218_s20 }
  0xeb   :  { %v181_v36 = vpop.permute.xlu2 %180 }
  0xf3   :  { %v189_v37 = vpop.permute.xlu2 %188 }
  0xfb   :  { %v225_v38 = vpop.permute.xlu2 %224  ;;  %v179_v39 = vpop.permute.xlu0 %178 }
  0xfc   :  { %v171_v40 = vpop.permute.xlu1 %170  ;;  %1049 = vmatpush.xpose.msk.msrb.mxu3 %vm226_vm1, %v225_v38 }
  0xfd   :  { %283 = vrot.lane.b32.xlu0 %v171_v40, %s1220_s21 }
 0x103   :  { %v173_v41 = vpop.permute.xlu0 %172  ;;  %v185_v43 = vpop.permute.xlu2 %184 }
 0x104   :  { %285 = vrot.lane.b32.xlu1 %v173_v41, %s1220_s21 }
 0x105   :  { %343 = vrot.lane.b32.xlu0 %v179_v39, %s1220_s21 }
 0x10b   :  { %v175_v42 = vpop.permute.xlu1 %174  ;;  %v256_v49 = vpop.permute.xlu2 %255 }
 0x10c   :  { %313 = vrot.lane.b32.xlu2 %v175_v42, %s1220_s21  ;;  %158 = vrot.lane.b32.xlu1 %v65_v33, %s1217_s19 }
 0x10d   :  { %345 = vrot.lane.b32.xlu0 %v181_v36, %s1220_s21 }
 0x113   :  { %v177_v44 = vpop.permute.xlu0 %176 }
 0x114   :  { %v183_v45 = vpop.permute.xlu1 %182  ;;  %315 = vrot.lane.b32.xlu2 %v177_v44, %s1220_s21  ;;  %160 = vrot.lane.b32.xlu1 %v68_v35, %s1217_s19 }
 0x115   :  { %405 = vrot.lane.b32.xlu0 %v189_v37, %s1220_s21 }
 0x11b   :  { %v187_v47 = vpop.permute.xlu0 %186 }
 0x11c   :  { %v223_v48 = vpop.permute.xlu1 %222  ;;  %375 = vrot.lane.b32.xlu2 %v185_v43, %s1220_s21 }
 0x11d   :  { %1050 = vmatpush.xpose.msk.msrb.mxu3 %vm226_vm1, %v223_v48  ;;  %162 = vrot.lane.b32.xlu0 %v65_v33, %s1219_s1 }
 0x120   :  { %1051 = vmatmul.msk.f32.vlgmr.msrb.gmra.mxu3 %vm226_vm1, %v65_v33 }
 0x121   :  { %1052 = vmatpush.xpose.msk.msra.mxu3 %vm226_vm1, %v256_v49 }
 0x123   :  { %v191_v51 = vpop.permute.xlu0 %190 }
 0x124   :  { %v155_v52 = vpop.permute.xlu1 %154  ;;  %373 = vrot.lane.b32.xlu2 %v183_v45, %s1220_s21 }
 0x125   :  { %164 = vrot.lane.b32.xlu0 %v68_v35, %s1219_s1 }
 0x12b   :  { %v254_v56 = vpop.permute.xlu0 %253 }
 0x12c   :  { %v193_v57 = vpop.permute.xlu1 %192  ;;  %403 = vrot.lane.b32.xlu2 %v187_v47, %s1220_s21  ;;  %1053 = vmatpush.xpose.msk.msra.mxu3 %vm226_vm1, %v254_v56 }
 0x12d   :  { %1103 = vrot.lane.b32.xlu0 %v1102_v55, %s1217_s19  ;;  %435 = vrot.lane.b32.xlu1 %v193_v57, %s1220_s21 }
 0x12f   :  { %1054 = vmatmul.msk.f32.vlgmr.msra.gmra.mxu3 %vm226_vm1, %v68_v35 }
 0x134   :  { %433 = vrot.lane.b32.xlu2 %v191_v51, %s1220_s21  ;;  %v157_v2 = vpop.permute.xlu1 %156 }
 0x135   :  { %1108 = vrot.lane.b32.xlu1 %v1117_v62, %s1218_s20  ;;  %1113 = vrot.lane.b32.xlu0 %v1102_v55, %s1219_s1 }
 0x13c   :  { %1098 = vrot.lane.b32.xlu2 %v1102_v55, %s1218_s20 }
 0x13d   :  { %1123 = vrot.lane.b32.xlu0 %v1117_v62, %s1219_s1 }
 0x144   :  { %1118 = vrot.lane.b32.xlu2 %v1117_v62, %s1217_s19 }
 0x14c   :  { %1128 = vrot.lane.b32.xlu2 %v1102_v55, %s1221_s22 }
 0x166   :  { %v314_v63 = vpop.permute.xlu2 %313 }
 0x16e   :  { %v316_v4 = vpop.permute.xlu2 %315 }
 0x16f   :  { %v284_v6 = vpop.permute.xlu0 %283  ;;  %1058 = vmatpush.xpose.msk.msrb.mxu3 %vm226_vm1, %v316_v4 }
 0x173   :  { %1059 = vmatpush.xpose.msk.msrb.mxu3 %vm226_vm1, %v314_v63 }
 0x176   :  { %v376_v7 = vpop.permute.xlu2 %375  ;;  %v286_v8 = vpop.permute.xlu1 %285  ;;  %1060 = vmatmul.msk.f32.vlgmr.msrb.gmra.mxu3 %vm226_vm1, %v157_v2 }
 0x177   :  { %v344_v9 = vpop.permute.xlu0 %343  ;;  %1055 = vmatpush.xpose.msk.msrb.mxu0 %vm226_vm1, %v286_v8  ;;  %1064 = vmatpush.xpose.msk.msra.mxu3 %vm226_vm1, %v376_v7 }
 0x17b   :  { %1056 = vmatpush.xpose.msk.msrb.mxu0 %vm226_vm1, %v284_v6 }
 0x17e   :  { %v374_v10 = vpop.permute.xlu2 %373  ;;  %1057 = vmatmul.msk.f32.vlgmr.msrb.gmra.mxu0 %vm226_vm1, %v155_v52  ;;  %v159_v11 = vpop.permute.xlu1 %158 }
 0x17f   :  { %v346_v12 = vpop.permute.xlu0 %345  ;;  %1065 = vmatpush.xpose.msk.msra.mxu3 %vm226_vm1, %v374_v10 }
 0x180   :  { %1061 = vmatpush.xpose.msk.msra.mxu0 %vm226_vm1, %v346_v12 }
 0x184   :  { %1062 = vmatpush.xpose.msk.msra.mxu0 %vm226_vm1, %v344_v9 }
 0x186   :  { %v404_v14 = vpop.permute.xlu2 %403  ;;  %v161_v15 = vpop.permute.xlu1 %160 }
 0x187   :  { %v406_v16 = vpop.permute.xlu0 %405  ;;  %1063 = vmatmul.msk.f32.vlgmr.msra.gmra.mxu0 %vm226_vm1, %v159_v11  ;;  %1066 = vmatmul.msk.f32.vlgmr.msra.gmra.mxu3 %vm226_vm1, %v161_v15 }
 0x188   :  { %1067 = vmatpush.xpose.msk.msrb.mxu0 %vm226_vm1, %v406_v16 }
 0x18c   :  { %1068 = vmatpush.xpose.msk.msrb.mxu0 %vm226_vm1, %v404_v14 }
 0x18e   :  { %v434_v17 = vpop.permute.xlu2 %433 }
 0x18f   :  { %v163_v18 = vpop.permute.xlu0 %162 }
 0x190   :  { %1069 = vmatmul.msk.f32.vlgmr.msrb.gmra.mxu0 %vm226_vm1, %v163_v18 }
 0x196   :  { %v1099_v19 = vpop.permute.xlu2 %1098 }
 0x197   :  { %v1100_v20 = vunpack.i.l.bf16 %v1099_v19  ;;  %v165_v21 = vpop.permute.xlu0 %164  ;;  %v1101_v24 = vunpack.i.h.bf16 %v1099_v19 }
 0x199   :  { %v1132_v22 = vpack.i.bf16 %v150_v61, %v1100_v20 }
 0x19b   :  { %1133 = vrot.lane.b32.xlu0 %v1132_v22, %s1221_s22 }
 0x19e   :  { %v1418_v31 = vpop.permute.xlu2 %1118 }
 0x19f   :  { %v1104_v25 = vpop.permute.xlu0 %1103  ;;  %v436_v26 = vpop.permute.xlu1 %435  ;;  %v1121_v35 = vunpack.i.h.bf16 %v1418_v31 }
 0x1a0   :  { %v1105_v27 = vunpack.i.l.bf16 %v1104_v25  ;;  %1070 = vmatpush.xpose.msk.msrb.mxu1 %vm226_vm1, %v436_v26  ;;  %v1106_v62 = vunpack.i.h.bf16 %v1104_v25 }
 0x1a2   :  { %v1414_v28 = vpack.i.bf16 %v1101_v24, %v1105_v27  ;;  %v1142_v2 = vpack.i.bf16 %v1106_v62, %v1388_v60 }
 0x1a3   :  { %v250_v29 = vpop.f32.mrf.mxu3 }
 0x1a4   :  { %1071 = vmatpush.xpose.msk.msrb.mxu1 %vm226_vm1, %v434_v17  ;;  %v464_v30 = vsel %vm463_vm2, %v250_v29, -inf }
 0x1a5   :  { %465 = vmax.xlane.f32.xlu1 %v464_v30 }
 0x1a6   :  { %v1129_v32 = vpop.permute.xlu2 %1128 }
 0x1a7   :  { %1072 = vmatmul.msk.f32.vlgmr.msrb.gmra.mxu1 %vm226_vm1, %v165_v21  ;;  %v1130_v33 = vunpack.i.l.bf16 %v1129_v32  ;;  %v1131_v34 = vunpack.i.h.bf16 %v1129_v32  ;;  %v1114_v36 = vpop.permute.xlu0 %1113  ;;  %v1433_v54 = vpop.permute.xlu1 %1108 }
 0x1a8   :  { %v1116_v37 = vunpack.i.h.bf16 %v1114_v36  ;;  %v1115_v56 = vunpack.i.l.bf16 %v1114_v36  ;;  %v1110_v57 = vunpack.i.l.bf16 %v1433_v54 }
 0x1a9   :  { %679 = vmatpush.msrb.mxu2 %v1130_v33 }
 0x1aa   :  { %v1422_v39 = vpack.i.bf16 %v1121_v35, %v1116_v37  ;;  %v1147_v59 = vpack.i.bf16 %v1115_v56, %v1110_v57 }
 0x1ab   :  { %680 = vmatpush.msrb.mxu2 %v1131_v34 }
 0x1af   :  { %v1429_v46 = vpop.permute.xlu0 %1123 }
 0x1b2   :  { %v280_v38 = vpop.f32.mrf.mxu3 }
 0x1b3   :  { %v467_v40 = vsel %vm463_vm2, %v280_v38, -inf }
 0x1c5   :  { %468 = vmax.xlane.f32.xlu0 %v467_v40 }
 0x1f9   :  { %v1426_v43 = vpop.f32.mrf.mxu3 }
 0x1fa   :  { %v473_v8 = vsel %vm463_vm2, %v1426_v43, -inf }
 0x1fb   :  { %v310_v41 = vpop.f32.mrf.mxu0 }
 0x1fc   :  { %v470_v42 = vsel %vm463_vm2, %v310_v41, -inf }
 0x1fd   :  { %471 = vmax.xlane.f32.xlu2 %v470_v42 }
 0x204   :  { %v370_v44 = vpop.f32.mrf.mxu0 }
 0x205   :  { %v476_v45 = vsel %vm463_vm2, %v370_v44, -inf }
 0x206   :  { %477 = vmax.xlane.f32.xlu2 %v476_v45 }
 0x20a   :  { %v400_v47 = vpop.f32.mrf.mxu3 }
 0x20b   :  { %v479_v48 = vsel %vm463_vm2, %v400_v47, -inf }
 0x20c   :  { %480 = vmax.xlane.f32.xlu0 %v479_v48 }
 0x20d   :  { %v430_v49 = vpop.f32.mrf.mxu0  ;;  %v1134_v50 = vpop.permute.xlu0 %1133 }
 0x20e   :  { %v1136_v51 = vunpack.i.h.bf16 %v1134_v50  ;;  %v1135_v52 = vunpack.i.l.bf16 %v1134_v50  ;;  %v482_v53 = vsel %vm463_vm2, %v430_v49, -inf }
 0x20f   :  { %483 = vmax.xlane.f32.xlu2 %v482_v53 }
 0x210   :  { %708 = vmatpush.msrb.mxu3 %v1136_v51  ;;  %737 = vmatpush.msra.mxu0 %v1135_v52 }
 0x218   :  { %v466_v55 = vpop.xlane.xlu1 %465 }
 0x219   :  { %v488_v58 = vsub.f32 %v250_v29, %v466_v55 }
 0x21b   :  { %v496_v61 = vmul.f32 1.442695, %v488_v58 }
 0x21d   :  { %1177 = vpow2.f32 %v496_v61 }
 0x220   :  { %1148 = vrot.lane.b32.xlu0 %v1147_v59, %s1221_s22 }
 0x223   :  { %v1440_v6 = vpop.eup %1177 }
 0x224   :  { %v460_v63 = vpop.f32.mrf.mxu1  ;;  %v512_v7 = vsel %vm463_vm2, %v1440_v6, 0.0 }
 0x225   :  { %v485_v4 = vsel %vm463_vm2, %v460_v63, -inf }
 0x226   :  { %486 = vmax.xlane.f32.xlu1 %v485_v4 }
 0x227   :  { %1143 = vrot.lane.b32.xlu2 %v1142_v2, %s1221_s22 }
 0x22e   :  { %513 = vadd.xlane.f32.xlu1 %v512_v7 }
 0x236   :  { %474 = vmax.xlane.f32.xlu1 %v473_v8 }
 0x238   :  { %v469_v9 = vpop.xlane.xlu0 %468 }
 0x239   :  { %v489_v10 = vsub.f32 %v280_v38, %v469_v9 }
 0x23b   :  { %v498_v11 = vmul.f32 1.442695, %v489_v10 }
 0x23d   :  { %1179 = vpow2.f32 %v498_v11 }
 0x243   :  { %v1446_v60 = vpop.eup %1179 }
 0x244   :  { %v515_v12 = vsel %vm463_vm2, %v1446_v60, 0.0 }
 0x24a   :  { %516 = vadd.xlane.f32.xlu0 %v515_v12 }
 0x24f   :  { %1138 = vrot.lane.b32.xlu1 %v1414_v28, %s1221_s22 }
 0x270   :  { %v472_v14 = vpop.xlane.xlu2 %471 }
 0x271   :  { %v490_v15 = vsub.f32 %v310_v41, %v472_v14 }
 0x273   :  { %v500_v16 = vmul.f32 1.442695, %v490_v15  ;;  %v1120_v15 = vunpack.i.l.bf16 %v1418_v31 }
 0x275   :  { %1181 = vpow2.f32 %v500_v16  ;;  %v1111_v16 = vunpack.i.h.bf16 %v1433_v54 }
 0x279   :  { %v478_v17 = vpop.xlane.xlu2 %477 }
 0x27a   :  { %v492_v18 = vsub.f32 %v370_v44, %v478_v17 }
 0x27b   :  { %v1452_v19 = vpop.eup %1181 }
 0x27c   :  { %v504_v20 = vmul.f32 1.442695, %v492_v18  ;;  %v518_v21 = vsel %vm463_vm2, %v1452_v19, 0.0 }
 0x27d   :  { %519 = vadd.xlane.f32.xlu2 %v518_v21  ;;  %v1152_v21 = vpack.i.bf16 %v1111_v16, %v1120_v15 }
 0x27e   :  { %1183 = vpow2.f32 %v504_v20 }
 0x27f   :  { %v481_v22 = vpop.xlane.xlu0 %480 }
 0x280   :  { %v493_v24 = vsub.f32 %v400_v47, %v481_v22 }
 0x282   :  { %v506_v25 = vmul.f32 1.442695, %v493_v24  ;;  %v484_v26 = vpop.xlane.xlu2 %483 }
 0x283   :  { %v494_v27 = vsub.f32 %v430_v49, %v484_v26 }
 0x284   :  { %v1456_v28 = vpop.eup %1183  ;;  %1185 = vpow2.f32 %v506_v25 }
 0x285   :  { %v508_v29 = vmul.f32 1.442695, %v494_v27  ;;  %v524_v30 = vsel %vm463_vm2, %v1456_v28, 0.0 }
 0x286   :  { %525 = vadd.xlane.f32.xlu1 %v524_v30 }
 0x287   :  { %1187 = vpow2.f32 %v508_v29 }
 0x28a   :  { %v1460_v32 = vpop.eup %1185  ;;  %v1144_v33 = vpop.permute.xlu2 %1143 }
 0x28b   :  { %v1145_v34 = vunpack.i.l.bf16 %v1144_v33  ;;  %v527_v35 = vsel %vm463_vm2, %v1460_v32, 0.0  ;;  %v1146_v12 = vunpack.i.h.bf16 %v1144_v33 }
 0x28c   :  { %528 = vadd.xlane.f32.xlu0 %v527_v35 }
 0x28d   :  { %v1464_v36 = vpop.eup %1187  ;;  %709 = vmatpush.msrb.mxu3 %v1145_v34 }
 0x28e   :  { %v530_v37 = vsel %vm463_vm2, %v1464_v36, 0.0 }
 0x28f   :  { %531 = vadd.xlane.f32.xlu1 %v530_v37 }
 0x292   :  { %v1149_v38 = vpop.permute.xlu0 %1148 }
 0x293   :  { %v1150_v40 = vunpack.i.l.bf16 %v1149_v38  ;;  %v1151_v10 = vunpack.i.h.bf16 %v1149_v38 }
 0x295   :  { %766 = vmatpush.msra.mxu1 %v1150_v40 }
 0x299   :  { %v487_v41 = vpop.xlane.xlu1 %486 }
 0x29a   :  { %v495_v42 = vsub.f32 %v460_v63, %v487_v41 }
 0x29c   :  { %v510_v44 = vmul.f32 1.442695, %v495_v42 }
 0x29e   :  { %1189 = vpow2.f32 %v510_v44 }
 0x2a0   :  { %1158 = vrot.lane.b32.xlu0 %v1422_v39, %s1221_s22 }
 0x2a1   :  { %v514_v45 = vpop.xlane.xlu1 %513 }
 0x2a2   :  { %1191 = vrcp.f32 %v514_v45  ;;  %v547_v55 = vand.u32 2147483648, %v514_v45  ;;  %v545_v58 = vand.u32 2147483647, %v514_v45  ;;  %vm541_vm4 = vweird.f32 %v514_v45 }
 0x2a4   :  { %v1470_v47 = vpop.eup %1189  ;;  %v548_v59 = vor.u32 1.1754944e-38, %v547_v55  ;;  %vm546_vm6 = vcmp.eq.f32.partialorder %v545_v58, 8.507059e+37 }
 0x2a5   :  { %v533_v48 = vsel %vm463_vm2, %v1470_v47, 0.0 }
 0x2a6   :  { %534 = vadd.xlane.f32.xlu1 %v533_v48 }
 0x2a8   :  { %v1192_v49 = vpop.eup %1191 }
 0x2a9   :  { %v537_v50 = vmul.f32 %v1192_v49, %v514_v45  ;;  %v475_v51 = vpop.xlane.xlu1 %474  ;;  %vm542_vm3 = vweird.f32 %v1192_v49 }
 0x2aa   :  { %v491_v52 = vsub.f32 %v1426_v43, %v475_v51  ;;  %vm543_vm5 = vmor %vm541_vm4, %vm542_vm3 }
 0x2ab   :  { %v538_v53 = vsub.f32 1.0, %v537_v50 }
 0x2ac   :  { %v502_v56 = vmul.f32 1.442695, %v491_v52 }
 0x2ad   :  { %v539_v57 = vmul.f32 %v1192_v49, %v538_v53 }
 0x2ae   :  { %1193 = vpow2.f32 %v502_v56 }
 0x2af   :  { %v540_v39 = vadd.f32 %v1192_v49, %v539_v57 }
 0x2b1   :  { %v544_v61 = vsel %vm543_vm5, %v1192_v49, %v540_v39 }
 0x2b2   :  { %v549_v62 = vsel %vm546_vm6, %v548_v59, %v544_v61 }
 0x2b3   :  { %v550_v63 = vmul.f32 %v1440_v6, %v549_v62 }
 0x2b4   :  { %v1476_v2 = vpop.eup %1193 }
 0x2b5   :  { %1073 = vmatmul.msk.f32.vlgmr.msrb.gmra.mxu2 %vm463_vm2, %v550_v63  ;;  %v521_v43 = vsel %vm463_vm2, %v1476_v2, 0.0 }
 0x2b6   :  { %522 = vadd.xlane.f32.xlu2 %v521_v43 }
 0x2bd   :  { %v517_v4 = vpop.xlane.xlu0 %516 }
 0x2be   :  { %1195 = vrcp.f32 %v517_v4  ;;  %v562_v17 = vand.u32 2147483648, %v517_v4  ;;  %vm556_vm8 = vweird.f32 %v517_v4 }
 0x2bf   :  { %1163 = vrot.lane.b32.xlu1 %v1429_v46, %s1221_s22  ;;  %v560_v46 = vand.u32 2147483647, %v517_v4 }
 0x2c0   :  { %v563_v22 = vor.u32 1.1754944e-38, %v562_v17 }
 0x2c1   :  { %v1139_v7 = vpop.permute.xlu1 %1138  ;;  %vm561_vm10 = vcmp.eq.f32.partialorder %v560_v46, 8.507059e+37 }
 0x2c2   :  { %v1141_v8 = vunpack.i.h.bf16 %v1139_v7  ;;  %v1140_v9 = vunpack.i.l.bf16 %v1139_v7 }
 0x2c4   :  { %v1196_v11 = vpop.eup %1195  ;;  %738 = vmatpush.msra.mxu0 %v1141_v8  ;;  %795 = vmatpush.msra.mxu2 %v1140_v9 }
 0x2c5   :  { %v552_v6 = vmul.f32 %v1196_v11, %v517_v4  ;;  %vm557_vm7 = vweird.f32 %v1196_v11 }
 0x2c6   :  { %853 = vmatpush.msrb.mxu0 %v1151_v10  ;;  %796 = vmatpush.msra.mxu2 %v1146_v12  ;;  %vm558_vm9 = vmor %vm556_vm8, %vm557_vm7 }
 0x2c7   :  { %v553_v14 = vsub.f32 1.0, %v552_v6 }
 0x2c9   :  { %v554_v18 = vmul.f32 %v1196_v11, %v553_v14 }
 0x2cb   :  { %v555_v20 = vadd.f32 %v1196_v11, %v554_v18 }
 0x2cd   :  { %v559_v24 = vsel %vm558_vm9, %v1196_v11, %v555_v20 }
 0x2ce   :  { %v564_v25 = vsel %vm561_vm10, %v563_v22, %v559_v24  ;;  %1153 = vrot.lane.b32.xlu2 %v1152_v21, %s1221_s22 }
 0x2cf   :  { %v565_v26 = vmul.f32 %v1446_v60, %v564_v25 }
 0x2d1   :  { %1074 = vmatmul.msk.f32.vlgmr.msrb.gmra.mxu3 %vm463_vm2, %v565_v26 }
 0x2f0   :  { %v520_v31 = vpop.xlane.xlu2 %519 }
 0x2f1   :  { %1197 = vrcp.f32 %v520_v31  ;;  %v577_v33 = vand.u32 2147483648, %v520_v31  ;;  %v575_v35 = vand.u32 2147483647, %v520_v31  ;;  %vm571_vm12 = vweird.f32 %v520_v31 }
 0x2f3   :  { %v578_v38 = vor.u32 1.1754944e-38, %v577_v33  ;;  %vm576_vm14 = vcmp.eq.f32.partialorder %v575_v35, 8.507059e+37 }
 0x2f7   :  { %v1198_v54 = vpop.eup %1197 }
 0x2f8   :  { %v567_v27 = vmul.f32 %v1198_v54, %v520_v31  ;;  %vm572_vm11 = vweird.f32 %v1198_v54 }
 0x2f9   :  { %v526_v29 = vpop.xlane.xlu1 %525  ;;  %vm573_vm13 = vmor %vm571_vm12, %vm572_vm11 }
 0x2fa   :  { %v568_v30 = vsub.f32 1.0, %v567_v27  ;;  %1199 = vrcp.f32 %v526_v29  ;;  %v607_v49 = vand.u32 2147483648, %v526_v29  ;;  %v605_v51 = vand.u32 2147483647, %v526_v29 }
 0x2fb   :  { %vm601_vm3 = vweird.f32 %v526_v29 }
 0x2fc   :  { %v569_v34 = vmul.f32 %v1198_v54, %v568_v30  ;;  %v608_v53 = vor.u32 1.1754944e-38, %v607_v49  ;;  %vm606_vm5 = vcmp.eq.f32.partialorder %v605_v51, 8.507059e+37 }
 0x2fe   :  { %v570_v37 = vadd.f32 %v1198_v54, %v569_v34 }
 0x2ff   :  { %v529_v58 = vpop.xlane.xlu0 %528 }
 0x300   :  { %v1200_v40 = vpop.eup %1199  ;;  %v574_v41 = vsel %vm573_vm13, %v1198_v54, %v570_v37  ;;  %v622_v46 = vand.u32 2147483648, %v529_v58  ;;  %vm616_vm11 = vweird.f32 %v529_v58  ;;  %v620_v20 = vand.u32 2147483647, %v529_v58 }
 0x301   :  { %v579_v60 = vsel %vm576_vm14, %v578_v38, %v574_v41  ;;  %v597_v42 = vmul.f32 %v1200_v40, %v526_v29  ;;  %vm602_vm15 = vweird.f32 %v1200_v40 }
 0x302   :  { %v532_v44 = vpop.xlane.xlu1 %531  ;;  %v580_v45 = vmul.f32 %v1452_v19, %v579_v60  ;;  %vm603_vm4 = vmor %vm601_vm3, %vm602_vm15  ;;  %v623_v22 = vor.u32 1.1754944e-38, %v622_v46  ;;  %vm621_vm13 = vcmp.eq.f32.partialorder %v620_v20, 8.507059e+37 }
 0x303   :  { %v598_v48 = vsub.f32 1.0, %v597_v42  ;;  %1201 = vrcp.f32 %v532_v44  ;;  %v637_v61 = vand.u32 2147483648, %v532_v44  ;;  %v635_v63 = vand.u32 2147483647, %v532_v44 }
 0x304   :  { %1075 = vmatmul.msk.f32.vlgmr.msra.gmra.mxu0 %vm463_vm2, %v580_v45  ;;  %vm631_vm7 = vweird.f32 %v532_v44  ;;  %1203 = vrcp.f32 %v529_v58 }
 0x305   :  { %v599_v50 = vmul.f32 %v1200_v40, %v598_v48  ;;  %v638_v4 = vor.u32 1.1754944e-38, %v637_v61  ;;  %vm636_vm9 = vcmp.eq.f32.partialorder %v635_v63, 8.507059e+37 }
 0x307   :  { %v600_v52 = vadd.f32 %v1200_v40, %v599_v50 }
 0x309   :  { %v1202_v55 = vpop.eup %1201  ;;  %v604_v56 = vsel %vm603_vm4, %v1200_v40, %v600_v52 }
 0x30a   :  { %v609_v57 = vsel %vm606_vm5, %v608_v53, %v604_v56  ;;  %v627_v39 = vmul.f32 %v1202_v55, %v532_v44  ;;  %vm632_vm6 = vweird.f32 %v1202_v55 }
 0x30b   :  { %v610_v19 = vmul.f32 %v1456_v28, %v609_v57  ;;  %vm633_vm8 = vmor %vm631_vm7, %vm632_vm6  ;;  %v1204_v28 = vpop.eup %1203 }
 0x30c   :  { %v628_v59 = vsub.f32 1.0, %v627_v39  ;;  %v612_v12 = vmul.f32 %v1204_v28, %v529_v58  ;;  %vm617_vm10 = vweird.f32 %v1204_v28  ;;  %v1167_v58 = vpack.i.bf16 %v1255_v1, %v1250_v0 }
 0x30d   :  { %1077 = vmatmul.msk.f32.vlgmr.msra.gmra.mxu2 %vm463_vm2, %v610_v19  ;;  %vm618_vm12 = vmor %vm616_vm11, %vm617_vm10  ;;  %v1172_v39 = vpack.i.bf16 %v1277_v5, %v1265_v3 }
 0x30e   :  { %v629_v62 = vmul.f32 %v1202_v55, %v628_v59  ;;  %v613_v14 = vsub.f32 1.0, %v612_v12  ;;  %1168 = vrot.lane.b32.xlu2 %v1167_v58, %s1222_s23  ;;  %v1216_v58 = vld [vmem:[%s1530_s2 + $0x20] sm:$0x7] }
 0x30f   :  { %1173 = vrot.lane.b32.xlu1 %v1172_v39, %s1222_s23  ;;  %v1021_v39 = vperm.slane %v1216_v58, 1 }
 0x310   :  { %v630_v43 = vadd.f32 %v1202_v55, %v629_v62  ;;  %v614_v15 = vmul.f32 %v1204_v28, %v613_v14 }
 0x312   :  { %v634_v7 = vsel %vm633_vm8, %v1202_v55, %v630_v43  ;;  %v1159_v8 = vpop.permute.xlu0 %1158  ;;  %v615_v18 = vadd.f32 %v1204_v28, %v614_v15 }
 0x313   :  { %v639_v9 = vsel %vm636_vm9, %v638_v4, %v634_v7  ;;  %v1160_v10 = vunpack.i.l.bf16 %v1159_v8  ;;  %v1161_v35 = vunpack.i.h.bf16 %v1159_v8  ;;  %vm916_vm9 = vcmask 195584  }
 0x314   :  { %v640_v11 = vmul.f32 %v1464_v36, %v639_v9  ;;  %v619_v36 = vsel %vm618_vm12, %v1204_v28, %v615_v18 }
 0x315   :  { %854 = vmatpush.msrb.mxu0 %v1160_v10  ;;  %v624_v26 = vsel %vm621_vm13, %v623_v22, %v619_v36 }
 0x316   :  { %1079 = vmatmul.msk.f32.vlgmr.msrb.gmra.mxu0 %vm463_vm2, %v640_v11  ;;  %v625_v40 = vmul.f32 %v1460_v32, %v624_v26 }
 0x319   :  { %v535_v6 = vpop.xlane.xlu1 %534 }
 0x31a   :  { %1205 = vrcp.f32 %v535_v6  ;;  %v652_v50 = vand.u32 2147483648, %v535_v6  ;;  %vm646_vm6 = vweird.f32 %v535_v6  ;;  %v650_v32 = vand.u32 2147483647, %v535_v6 }
 0x31c   :  { %v653_v55 = vor.u32 1.1754944e-38, %v652_v50  ;;  %vm651_vm8 = vcmp.eq.f32.partialorder %v650_v32, 8.507059e+37 }
 0x320   :  { %v1206_v16 = vpop.eup %1205 }
 0x321   :  { %v642_v21 = vmul.f32 %v1206_v16, %v535_v6  ;;  %vm647_vm4 = vweird.f32 %v1206_v16 }
 0x322   :  { %vm648_vm7 = vmor %vm646_vm6, %vm647_vm4 }
 0x323   :  { %v643_v25 = vsub.f32 1.0, %v642_v21  ;;  %v1215_v21 = vld [vmem:[%s1532_s0] sm:$0xff] }
 0x325   :  { %v644_v37 = vmul.f32 %v1206_v16, %v643_v25 }
 0x327   :  { %v645_v48 = vadd.f32 %v1206_v16, %v644_v37 }
 0x329   :  { %v523_v17 = vpop.xlane.xlu2 %522  ;;  %v649_v53 = vsel %vm648_vm7, %v1206_v16, %v645_v48 }
 0x32a   :  { %1207 = vrcp.f32 %v523_v17  ;;  %v592_v38 = vand.u32 2147483648, %v523_v17  ;;  %v590_v60 = vand.u32 2147483647, %v523_v17  ;;  %vm586_vm15 = vweird.f32 %v523_v17 }
 0x32b   :  { %v654_v56 = vsel %vm651_vm8, %v653_v55, %v649_v53 }
 0x32c   :  { %v593_v45 = vor.u32 1.1754944e-38, %v592_v38  ;;  %vm591_vm5 = vcmp.eq.f32.partialorder %v590_v60, 8.507059e+37  ;;  %v655_v57 = vmul.f32 %v1470_v47, %v654_v56 }
 0x330   :  { %v1208_v24 = vpop.eup %1207 }
 0x331   :  { %v582_v31 = vmul.f32 %v1208_v24, %v523_v17  ;;  %v1154_v54 = vpop.permute.xlu2 %1153  ;;  %v1164_v27 = vpop.permute.xlu1 %1163  ;;  %vm587_vm14 = vweird.f32 %v1208_v24 }
 0x332   :  { %v1156_v29 = vunpack.i.h.bf16 %v1154_v54  ;;  %v1155_v30 = vunpack.i.l.bf16 %v1154_v54  ;;  %v1165_v33 = vunpack.i.l.bf16 %v1164_v27  ;;  %v1166_v42 = vunpack.i.h.bf16 %v1164_v27  ;;  %vm588_vm3 = vmor %vm586_vm15, %vm587_vm14 }
 0x333   :  { %v583_v34 = vsub.f32 1.0, %v582_v31  ;;  %v1226_v54 = vmov 32.0  }
 0x334   :  { %767 = vmatpush.msra.mxu1 %v1156_v29  ;;  %824 = vmatpush.msra.mxu3 %v1155_v30  ;;  %1209 = vrcp.f32 %v1226_v54 }
 0x335   :  { %v584_v41 = vmul.f32 %v1208_v24, %v583_v34 }
 0x336   :  { %882 = vmatpush.msrb.mxu1 %v1165_v33  ;;  %825 = vmatpush.msra.mxu3 %v1161_v35 }
 0x337   :  { %v585_v44 = vadd.f32 %v1208_v24, %v584_v41  ;;  %1078 = vmatmul.msk.f32.vlgmr.msra.gmra.mxu3 %vm463_vm2, %v625_v40 }
 0x338   :  { %883 = vmatpush.msrb.mxu1 %v1166_v42  ;;  %v682_v19 = vpop.f32.mrf.mxu2 }
 0x339   :  { %v589_v49 = vsel %vm588_vm3, %v1208_v24, %v585_v44 }
 0x33a   :  { %v594_v51 = vsel %vm591_vm5, %v593_v45, %v589_v49  ;;  %v1210_v27 = vpop.eup %1209 }
 0x33b   :  { %v595_v52 = vmul.f32 %v1476_v2, %v594_v51  ;;  %v977_v29 = vmul.f32 32.0, %v1210_v27 }
 0x33d   :  { %1076 = vmatmul.msk.f32.vlgmr.msra.gmra.mxu1 %vm463_vm2, %v595_v52  ;;  %v978_v30 = vsub.f32 1.0, %v977_v29 }
 0x33f   :  { %v979_v33 = vmul.f32 %v1210_v27, %v978_v30 }
 0x341   :  { %v980_v34 = vadd.f32 %v1210_v27, %v979_v33 }
 0x345   :  { %1080 = vmatmul.msk.f32.vlgmr.msrb.gmra.mxu1 %vm463_vm2, %v655_v57 }
 0x354   :  { %v711_v47 = vpop.f32.mrf.mxu3 }
 0x368   :  { %v1169_v0 = vpop.permute.xlu2 %1168 }
 0x369   :  { %v1171_v1 = vunpack.i.h.bf16 %v1169_v0  ;;  %v1170_v43 = vunpack.i.l.bf16 %v1169_v0 }
 0x36b   :  { %957 = vmatpush.msrb.mxu2 %v1170_v43 }
 0x36d   :  { %958 = vmatpush.msrb.mxu2 %v1171_v1 }
 0x381   :  { %v740_v2 = vpop.f32.mrf.mxu0  ;;  %v1174_v5 = vpop.permute.xlu1 %1173 }
 0x382   :  { %890 = vrot.lane.b32.xlu0 %v740_v2, %s1223_s24  ;;  %v1176_v4 = vunpack.i.h.bf16 %v1174_v5  ;;  %v1175_v7 = vunpack.i.l.bf16 %v1174_v5 }
 0x384   :  { %959 = vmatpush.msrb.mxu2 %v1175_v7 }
 0x386   :  { %960 = vmatpush.msrb.mxu2 %v1176_v4 }
 0x390   :  { %v798_v59 = vpop.f32.mrf.mxu2 }
 0x391   :  { %898 = vrot.lane.b32.xlu2 %v798_v59, %s1224_s25 }
 0x393   :  { %v856_v61 = vpop.f32.mrf.mxu0 }
 0x394   :  { %906 = vrot.lane.b32.xlu0 %v856_v61, %s1225_s26 }
 0x3ba   :  { %v769_v62 = vpop.f32.mrf.mxu1  ;;  %v827_v63 = vpop.f32.mrf.mxu3 }
 0x3bb   :  { %900 = vrot.lane.b32.xlu2 %v827_v63, %s1224_s25  ;;  %892 = vrot.lane.b32.xlu1 %v769_v62, %s1223_s24 }
 0x3c2   :  { %v885_v3 = vpop.f32.mrf.mxu1 }
 0x3c3   :  { %908 = vrot.lane.b32.xlu0 %v885_v3, %s1225_s26  ;;  %936 = vrot.lane.b32.xlu1 %v1335_v23, %s1222_s23 }
 0x3eb   :  { %v899_v10 = vpop.permute.xlu2 %898 }
 0x3f4   :  { %v891_v8 = vpop.permute.xlu0 %890 }
 0x3f5   :  { %v912_v9 = vsel %vm226_vm1, %v682_v19, %v891_v8  ;;  %v1024_v19 = vperm.slane %v1216_v58, 2 }
 0x3f6   :  { %v914_v11 = vsel %vm463_vm2, %v912_v9, %v899_v10 }
 0x406   :  { %v907_v28 = vpop.permute.xlu0 %906 }
 0x407   :  { %v917_v12 = vsel %vm916_vm9, %v914_v11, %v907_v28 }
 0x408   :  { %1081 = vmatmul.msk.f32.vlgmr.msrb.gmra.mxu2 %vm40_vm0, %v917_v12 }
 0x415   :  { %v901_v23 = vpop.permute.xlu2 %900 }
 0x42d   :  { %v893_v6 = vpop.permute.xlu1 %892 }
 0x42e   :  { %v913_v14 = vsel %vm226_vm1, %v711_v47, %v893_v6  ;;  %vm981_vm1 = vweird.f32 %v1210_v27 }
 0x42f   :  { %v915_v16 = vsel %vm463_vm2, %v913_v14, %v901_v23  ;;  %v982_v35 = vsel %vm981_vm1, %v1210_v27, %v980_v34 }
 0x435   :  { %v909_v15 = vpop.permute.xlu0 %908  ;;  %v937_v18 = vpop.permute.xlu1 %936 }
 0x436   :  { %v918_v17 = vsel %vm916_vm9, %v915_v16, %v909_v15 }
 0x437   :  { %1082 = vmatmul.msk.f32.gmra.mxu2 %vm40_vm0, %v918_v17 }
 0x48b   :  { %v962_v46 = vpop.f32.mrf.mxu2 }
 0x48c   :  { %v963_v20 = vadd.f32 %v962_v46, %v937_v18 }
 0x48e   :  { %v968_v36 = vadd.f32 %v1215_v21, %v963_v20 }
 0x490   :  { %v970_v22 = vsel %vm40_vm0, %v968_v36, 0.0 }
 0x491   :  { %971 = vadd.xlane.f32.xlu2 %v970_v22 }
 0x4ba   :  { %v965_v24 = vpop.f32.mrf.mxu2 }
 0x4bb   :  { %v966_v25 = vadd.f32 %v965_v24, %v937_v18 }
 0x4bd   :  { %v969_v26 = vadd.f32 %v966_v25, %v1307_v13 }
 0x4bf   :  { %v973_v31 = vsel %vm40_vm0, %v969_v26, 0.0 }
 0x4c0   :  { %974 = vadd.xlane.f32.xlu0 %v973_v31 }
 0x504   :  { %v972_v37 = vpop.xlane.xlu2 %971 }
 0x505   :  { %v983_v38 = vmul.f32 %v982_v35, %v972_v37 }
 0x507   :  { %v985_v40 = vsub.f32 %v968_v36, %v983_v38 }
 0x509   :  { %v987_v41 = vmul.f32 %v985_v40, %v985_v40 }
 0x50b   :  { %v989_v60 = vsel %vm40_vm0, %v987_v41, 0.0 }
 0x50c   :  { %990 = vadd.xlane.f32.xlu1 %v989_v60 }
 0x533   :  { %v975_v13 = vpop.xlane.xlu0 %974 }
 0x534   :  { %v984_v42 = vmul.f32 %v982_v35, %v975_v13 }
 0x536   :  { %v986_v44 = vsub.f32 %v969_v26, %v984_v42 }
 0x538   :  { %v988_v45 = vmul.f32 %v986_v44, %v986_v44 }
 0x53a   :  { %v992_v48 = vsel %vm40_vm0, %v988_v45, 0.0 }
 0x53b   :  { %993 = vadd.xlane.f32.xlu2 %v992_v48 }
 0x57f   :  { %v991_v49 = vpop.xlane.xlu1 %990 }
 0x580   :  { %v995_v50 = vmul.f32 %v991_v49, %v982_v35 }
 0x582   :  { %v997_v51 = vadd.f32 1e-05, %v995_v50 }
 0x584   :  { %1211 = vrsqrt.f32 %v997_v51  ;;  %vm1005_vm10 = vweird.f32 %v997_v51 }
 0x58a   :  { %v1212_v32 = vpop.eup %1211 }
 0x58b   :  { %v1000_v52 = vmul.f32 %v1212_v32, %v997_v51  ;;  %vm1006_vm2 = vweird.f32 %v1212_v32 }
 0x58c   :  { %vm1007_vm11 = vmor %vm1005_vm10, %vm1006_vm2 }
 0x58d   :  { %v1001_v53 = vmul.f32 %v1212_v32, %v1000_v52 }
 0x58f   :  { %v1002_v55 = vmul.f32 0.5, %v1001_v53 }
 0x591   :  { %v1003_v56 = vsub.f32 1.5, %v1002_v55 }
 0x593   :  { %v1004_v57 = vmul.f32 %v1212_v32, %v1003_v56 }
 0x595   :  { %v1008_v2 = vsel %vm1007_vm11, %v1212_v32, %v1004_v57 }
 0x596   :  { %v1019_v59 = vmul.f32 %v1008_v2, %v985_v40 }
 0x598   :  { %v1022_v61 = vmul.f32 %v1021_v39, %v1019_v59 }
 0x59a   :  { %v1025_v47 = vadd.f32 %v1024_v19, %v1022_v61 }
 0x59c   :  { %1027 = vst.msk [vmem:[%s1533_s3] sm:$0xff] %vm40_vm0, %v1025_v47 }
 0x5ae   :  { %v994_v62 = vpop.xlane.xlu2 %993 }
 0x5af   :  { %v996_v63 = vmul.f32 %v994_v62, %v982_v35 }
 0x5b1   :  { %v998_v0 = vadd.f32 1e-05, %v996_v63 }
 0x5b3   :  { %1213 = vrsqrt.f32 %v998_v0  ;;  %vm1015_vm13 = vweird.f32 %v998_v0 }
 0x5b9   :  { %v1214_v1 = vpop.eup %1213 }
 0x5ba   :  { %v1010_v43 = vmul.f32 %v1214_v1, %v998_v0  ;;  %vm1016_vm12 = vweird.f32 %v1214_v1 }
 0x5bb   :  { %vm1017_vm14 = vmor %vm1015_vm13, %vm1016_vm12 }
 0x5bc   :  { %v1011_v3 = vmul.f32 %v1214_v1, %v1010_v43 }
 0x5be   :  { %v1012_v5 = vmul.f32 0.5, %v1011_v3 }
 0x5c0   :  { %v1013_v4 = vsub.f32 1.5, %v1012_v5 }
 0x5c2   :  { %v1014_v7 = vmul.f32 %v1214_v1, %v1013_v4 }
 0x5c4   :  { %v1018_v8 = vsel %vm1017_vm14, %v1214_v1, %v1014_v7 }
 0x5c5   :  { %v1020_v9 = vmul.f32 %v1018_v8, %v986_v44 }
 0x5c7   :  { %v1023_v10 = vmul.f32 %v1021_v39, %v1020_v9 }
 0x5c9   :  { %v1026_v11 = vadd.f32 %v1024_v19, %v1023_v10 }
 0x5cb   :  { %1028 = vst.msk [vmem:[%s1533_s3 + $0x8] sm:$0xff] %vm40_vm0, %v1026_v11 }

</bundles_post_ra>
